<compile_context>
chip_gen: v6e
topology: v6e:2x2x1
jax: 0.10.0
libtpu: 0.0.40
codegen_flags: <defaults>
</compile_context>

<pallas_src>
import functools

import jax
import jax.numpy as jnp
from jax.experimental import pallas as pl
from jax.experimental.pallas import tpu as pltpu

IN_DIM = 123     # observation dim
HID1 = 256       # fc1 out
HID2 = 128       # fc2/fc3 out
OUT_DIM = 37     # action dim

IN_PAD = 128     # 123 -> 128 : lane-dense K for fc1 (col 123 carries the bias 1.0)
OUT_PAD = 128    # 37  -> 128 : lane-dense N for fc4 (unmasked stores)


def _round_up(n, m):
    return ((n + m - 1) // m) * m


def actor_mlp_kernel(x_ref, w1_ref, w2_ref, w3_ref, w4_ref, b_ref, o_ref):
    """Fused 4-layer MLP: ReLU(fc1) -> ReLU(fc2) -> ReLU(fc3) -> fc4."""
    x = x_ref[...]                    # (tile, 128) bf16; col 123 == 1.0 (fc1 bias trick)
    b = b_ref[...]                    # (3, 128)    f32 biases for fc2 / fc3 / fc4

    # fc1: bias folded into w1 row 123 via the ones column of x.
    h = jnp.dot(x, w1_ref[...], preferred_element_type=jnp.float32)      # (tile, 256)
    h = jnp.maximum(h, 0.0).astype(jnp.bfloat16)

    h = jnp.dot(h, w2_ref[...], preferred_element_type=jnp.float32)      # (tile, 128)
    h = jnp.maximum(h + b[0:1, :], 0.0).astype(jnp.bfloat16)

    h = jnp.dot(h, w3_ref[...], preferred_element_type=jnp.float32)      # (tile, 128)
    h = jnp.maximum(h + b[1:2, :], 0.0).astype(jnp.bfloat16)

    out = jnp.dot(h, w4_ref[...], preferred_element_type=jnp.float32)    # (tile, 128)
    o_ref[...] = (out + b[2:3, :]).astype(jnp.bfloat16)


@functools.partial(jax.jit, static_argnames=("row_tile",))
def actor_forward(x, weights, bias, *, row_tile=1024):
    """x: (batch, 123) float. weights: 4 bf16 (in, out) padded mats. bias: (3, 128) f32."""
    w1, w2, w3, w4 = weights
    batch = x.shape[0]

    # --- adaptive row tiling (static Python math: shapes are trace-time ints) -------
    b16 = _round_up(batch, 16)                       # bf16 sublane packing
    if b16 <= 256:
        n_prog = 1                                   # small batch: one program, no split
    else:
        n_prog = max(2, pl.cdiv(b16, row_tile))      # >= 2 programs so both v7x TCs engage
    tile = _round_up(pl.cdiv(b16, n_prog), 16)
    batch_pad = n_prog * tile

    # bf16 activation stream; col IN_DIM carries a 1.0 so fc1's bias rides the MXU.
    x_p = jnp.zeros((batch_pad, IN_PAD), jnp.bfloat16)
    x_p = x_p.at[:batch, :IN_DIM].set(x.astype(jnp.bfloat16))
    x_p = x_p.at[:batch, IN_DIM].set(1.0)

    const = lambda arr: pl.BlockSpec(arr.shape, lambda i: (0, 0))  # VMEM-resident

    out = pl.pallas_call(
        actor_mlp_kernel,
        out_shape=jax.ShapeDtypeStruct((batch_pad, OUT_PAD), jnp.bfloat16),
        grid=(n_prog,),
        in_specs=[
            pl.BlockSpec((tile, IN_PAD), lambda i: (i, 0)),   # activations: pipelined
            const(w1), const(w2), const(w3), const(w4),       # weights: loaded once
            const(bias),                                      # packed biases: loaded once
        ],
        out_specs=pl.BlockSpec((tile, OUT_PAD), lambda i: (i, 0)),
        compiler_params=pltpu.CompilerParams(
            dimension_semantics=("parallel",),   # megacore/v7x: split batch across TCs
            vmem_limit_bytes=32 << 20,           # safe on v7x's 64 MiB VMEM too
        ),
    )(x_p, w1, w2, w3, w4, bias)

    return out[:batch, :OUT_DIM].astype(jnp.float32)


def init_params(key, input_dim=IN_DIM, hidden_dim=HID1, output_dim=OUT_DIM):
    """f32 params mirroring nn.Linear default init, stored as (in, out)."""
    dims = [(input_dim, hidden_dim), (hidden_dim, HID2), (HID2, HID2), (HID2, output_dim)]
    names = ["fc1", "fc2", "fc3", "fc4"]
    params = {}
    for name, (fan_in, fan_out) in zip(names, dims):
        key, kw, kb = jax.random.split(key, 3)
        bound = 1.0 / jnp.sqrt(float(fan_in))
        w = jax.random.uniform(kw, (fan_in, fan_out), jnp.float32, -bound, bound)
        b = jax.random.uniform(kb, (fan_out,), jnp.float32, -bound, bound)
        params[name] = (w, b)
    return params


def pack_params(params):
    """Pad to lane-dense shapes, cast weights to bf16, fold b1 into w1, pack b2..b4."""
    (w1, b1), (w2, b2), (w3, b3), (w4, b4) = (
        params["fc1"], params["fc2"], params["fc3"], params["fc4"])

    w1p = jnp.zeros((IN_PAD, HID1), jnp.float32).at[:IN_DIM, :].set(w1)    # pad K rows
    w1p = w1p.at[IN_DIM, :].set(b1)                                        # fc1 bias row
    w4p = jnp.zeros((HID2, OUT_PAD), jnp.float32).at[:, :OUT_DIM].set(w4)  # pad N cols
    weights = tuple(w.astype(jnp.bfloat16) for w in (w1p, w2, w3, w4p))

    bias = jnp.zeros((3, OUT_PAD), jnp.float32)
    bias = bias.at[0, :HID2].set(b2)
    bias = bias.at[1, :HID2].set(b3)
    bias = bias.at[2, :OUT_DIM].set(b4)
    return weights, bias


def actor_forward_ref(x, params):
    """Pure-JAX reference."""
    h = x
    for name in ("fc1", "fc2", "fc3"):
        w, b = params[name]
        h = jnp.maximum(h @ w + b, 0.0)
    w, b = params["fc4"]
    return h @ w + b


if __name__ == "__main__":
    key = jax.random.PRNGKey(0)
    kx, kp = jax.random.split(key)

    batch = 8
    x = jax.random.normal(kx, (batch, IN_DIM), jnp.float32)
    params = init_params(kp)
    weights, bias = pack_params(params)

    out = actor_forward(x, weights, bias)
    out = jax.block_until_ready(out)
    assert out.shape == (batch, OUT_DIM), out.shape

    # Reference with bf16-rounded weights (and fc1 bias, which rides the MXU as a
    # bf16 weight row).  The kernel additionally rounds activations / output to bf16,
    # hence the widened tolerance.
    def _rnd(a):
        return a.astype(jnp.bfloat16).astype(jnp.float32)

    params_rt = {
        "fc1": (_rnd(params["fc1"][0]), _rnd(params["fc1"][1])),
        "fc2": (_rnd(params["fc2"][0]), params["fc2"][1]),
        "fc3": (_rnd(params["fc3"][0]), params["fc3"][1]),
        "fc4": (_rnd(params["fc4"][0]), params["fc4"][1]),
    }
    ref = actor_forward_ref(x, params_rt)
    assert jnp.allclose(out, ref, atol=5e-2, rtol=5e-2), \
        float(jnp.max(jnp.abs(out - ref)))

    print("KERNEL_OK")
</pallas_src>

<mosaic_0001>
module attributes {stable_mosaic.version = 11 : i64} {
  func.func @actor_mlp_kernel(%arg0: i32, %arg1: memref<16x128xbf16, #tpu.memory_space<vmem>>, %arg2: memref<128x256xbf16, #tpu.memory_space<vmem>>, %arg3: memref<256x128xbf16, #tpu.memory_space<vmem>>, %arg4: memref<128x128xbf16, #tpu.memory_space<vmem>>, %arg5: memref<128x128xbf16, #tpu.memory_space<vmem>>, %arg6: memref<3x128xf32, #tpu.memory_space<vmem>>, %arg7: memref<16x128xbf16, #tpu.memory_space<vmem>>) attributes {dimension_semantics = [#tpu.dimension_semantics<parallel>], iteration_bounds = array<i64: 1>, scalar_prefetch = 0 : i64, scratch_operands = 0 : i64, tpu.core_type = #tpu.core_type<tc>, window_params = [{transform_indices = @transform_0, window_bounds = array<i64: 16, 128>}, {pipeline_mode = #tpu.pipeline_mode<synchronous>, transform_indices = @transform_1, window_bounds = array<i64: 128, 256>}, {pipeline_mode = #tpu.pipeline_mode<synchronous>, transform_indices = @transform_2, window_bounds = array<i64: 256, 128>}, {pipeline_mode = #tpu.pipeline_mode<synchronous>, transform_indices = @transform_3, window_bounds = array<i64: 128, 128>}, {pipeline_mode = #tpu.pipeline_mode<synchronous>, transform_indices = @transform_4, window_bounds = array<i64: 128, 128>}, {pipeline_mode = #tpu.pipeline_mode<synchronous>, transform_indices = @transform_5, window_bounds = array<i64: 3, 128>}, {transform_indices = @transform_6, window_bounds = array<i64: 16, 128>}]} {
    %c0 = arith.constant 0 : index
    %c0_0 = arith.constant 0 : index
    %0 = vector.load %arg1[%c0, %c0_0] : memref<16x128xbf16, #tpu.memory_space<vmem>>, vector<16x128xbf16>
    %c0_1 = arith.constant 0 : index
    %c0_2 = arith.constant 0 : index
    %1 = vector.load %arg6[%c0_1, %c0_2] : memref<3x128xf32, #tpu.memory_space<vmem>>, vector<3x128xf32>
    %c0_3 = arith.constant 0 : index
    %c0_4 = arith.constant 0 : index
    %2 = vector.load %arg2[%c0_3, %c0_4] : memref<128x256xbf16, #tpu.memory_space<vmem>>, vector<128x256xbf16>
    %cst = arith.constant dense<0.000000e+00> : vector<16x256xf32>
    %3 = tpu.matmul %0, %2, %cst {dimension_numbers = #tpu.dot_dimension_numbers<[1], [0], [0], [1], [0, 0, 1, 1], [], []>} : vector<16x128xbf16>, vector<128x256xbf16>, vector<16x256xf32> -> vector<16x256xf32>
    %cst_5 = arith.constant 0.000000e+00 : f32
    %4 = vector.broadcast %cst_5 : f32 to vector<16x256xf32>
    %5 = arith.maximumf %3, %4 : vector<16x256xf32>
    %6 = arith.truncf %5 : vector<16x256xf32> to vector<16x256xbf16>
    %c0_6 = arith.constant 0 : index
    %c0_7 = arith.constant 0 : index
    %7 = vector.load %arg3[%c0_6, %c0_7] : memref<256x128xbf16, #tpu.memory_space<vmem>>, vector<256x128xbf16>
    %cst_8 = arith.constant dense<0.000000e+00> : vector<16x128xf32>
    %8 = tpu.matmul %6, %7, %cst_8 {dimension_numbers = #tpu.dot_dimension_numbers<[1], [0], [0], [1], [0, 0, 1, 1], [], []>} : vector<16x256xbf16>, vector<256x128xbf16>, vector<16x128xf32> -> vector<16x128xf32>
    %9 = vector.extract_strided_slice %1 {offsets = [0, 0], sizes = [1, 128], strides = [1, 1]} : vector<3x128xf32> to vector<1x128xf32>
    %10 = vector.broadcast %9 : vector<1x128xf32> to vector<16x128xf32>
    %11 = arith.addf %8, %10 : vector<16x128xf32>
    %cst_9 = arith.constant 0.000000e+00 : f32
    %12 = vector.broadcast %cst_9 : f32 to vector<16x128xf32>
    %13 = arith.maximumf %11, %12 : vector<16x128xf32>
    %14 = arith.truncf %13 : vector<16x128xf32> to vector<16x128xbf16>
    %c0_10 = arith.constant 0 : index
    %c0_11 = arith.constant 0 : index
    %15 = vector.load %arg4[%c0_10, %c0_11] : memref<128x128xbf16, #tpu.memory_space<vmem>>, vector<128x128xbf16>
    %cst_12 = arith.constant dense<0.000000e+00> : vector<16x128xf32>
    %16 = tpu.matmul %14, %15, %cst_12 {dimension_numbers = #tpu.dot_dimension_numbers<[1], [0], [0], [1], [0, 0, 1, 1], [], []>} : vector<16x128xbf16>, vector<128x128xbf16>, vector<16x128xf32> -> vector<16x128xf32>
    %17 = vector.extract_strided_slice %1 {offsets = [1, 0], sizes = [1, 128], strides = [1, 1]} : vector<3x128xf32> to vector<1x128xf32>
    %18 = vector.broadcast %17 : vector<1x128xf32> to vector<16x128xf32>
    %19 = arith.addf %16, %18 : vector<16x128xf32>
    %cst_13 = arith.constant 0.000000e+00 : f32
    %20 = vector.broadcast %cst_13 : f32 to vector<16x128xf32>
    %21 = arith.maximumf %19, %20 : vector<16x128xf32>
    %22 = arith.truncf %21 : vector<16x128xf32> to vector<16x128xbf16>
    %c0_14 = arith.constant 0 : index
    %c0_15 = arith.constant 0 : index
    %23 = vector.load %arg5[%c0_14, %c0_15] : memref<128x128xbf16, #tpu.memory_space<vmem>>, vector<128x128xbf16>
    %cst_16 = arith.constant dense<0.000000e+00> : vector<16x128xf32>
    %24 = tpu.matmul %22, %23, %cst_16 {dimension_numbers = #tpu.dot_dimension_numbers<[1], [0], [0], [1], [0, 0, 1, 1], [], []>} : vector<16x128xbf16>, vector<128x128xbf16>, vector<16x128xf32> -> vector<16x128xf32>
    %25 = vector.extract_strided_slice %1 {offsets = [2, 0], sizes = [1, 128], strides = [1, 1]} : vector<3x128xf32> to vector<1x128xf32>
    %26 = vector.broadcast %25 : vector<1x128xf32> to vector<16x128xf32>
    %27 = arith.addf %24, %26 : vector<16x128xf32>
    %28 = arith.truncf %27 : vector<16x128xf32> to vector<16x128xbf16>
    %c0_17 = arith.constant 0 : index
    %c0_18 = arith.constant 0 : index
    %29 = vector.load %arg7[%c0_17, %c0_18] : memref<16x128xbf16, #tpu.memory_space<vmem>>, vector<16x128xbf16>
    tpu.vector_store %arg7[%c0_17, %c0_18], %28 {strides = array<i32>} : memref<16x128xbf16, #tpu.memory_space<vmem>>, vector<16x128xbf16>,
    return
  }
  func.func @transform_0(%arg0: i32) -> (i32, i32) {
    %c0_i32 = arith.constant 0 : i32
    %c0_i32_0 = arith.constant 0 : i32
    return %arg0, %c0_i32 : i32, i32
  }
  func.func @transform_1(%arg0: i32) -> (i32, i32) {
    %c0_i32 = arith.constant 0 : i32
    %c0_i32_0 = arith.constant 0 : i32
    %c0_i32_1 = arith.constant 0 : i32
    return %c0_i32, %c0_i32_0 : i32, i32
  }
  func.func @transform_2(%arg0: i32) -> (i32, i32) {
    %c0_i32 = arith.constant 0 : i32
    %c0_i32_0 = arith.constant 0 : i32
    %c0_i32_1 = arith.constant 0 : i32
    return %c0_i32, %c0_i32_0 : i32, i32
  }
  func.func @transform_3(%arg0: i32) -> (i32, i32) {
    %c0_i32 = arith.constant 0 : i32
    %c0_i32_0 = arith.constant 0 : i32
    %c0_i32_1 = arith.constant 0 : i32
    return %c0_i32, %c0_i32_0 : i32, i32
  }
  func.func @transform_4(%arg0: i32) -> (i32, i32) {
    %c0_i32 = arith.constant 0 : i32
    %c0_i32_0 = arith.constant 0 : i32
    %c0_i32_1 = arith.constant 0 : i32
    return %c0_i32, %c0_i32_0 : i32, i32
  }
  func.func @transform_5(%arg0: i32) -> (i32, i32) {
    %c0_i32 = arith.constant 0 : i32
    %c0_i32_0 = arith.constant 0 : i32
    %c0_i32_1 = arith.constant 0 : i32
    return %c0_i32, %c0_i32_0 : i32, i32
  }
  func.func @transform_6(%arg0: i32) -> (i32, i32) {
    %c0_i32 = arith.constant 0 : i32
    %c0_i32_0 = arith.constant 0 : i32
    return %arg0, %c0_i32 : i32, i32
  }
}

</mosaic_0001>

<bundles_post_ra>
// kernel: actor_forward.1
= control target key start
LH: loop header
LB: loop body
LE: loop exit
PB: predicated region body
PF: predicated region fallthrough
CT: control target
= control target key end

     0   :  { %11 = vsyncpa [#allocation3], 0  ;;  %s1006_s0 = inlined_call_operand.vmem [shape: bf16[16,128], index: 0, kind: input, shape index: {}]   ;;  %s1007_s1 = inlined_call_operand.hbm [shape: bf16[128,256], index: 1, kind: input, shape index: {}]   ;;  %s1008_s2 = inlined_call_operand.hbm [shape: bf16[256,128], index: 2, kind: input, shape index: {}]   ;;  %s1009_s3 = inlined_call_operand.vmem [shape: bf16[128,128], index: 3, kind: input, shape index: {}]   ;;  %s1010_s4 = inlined_call_operand.hbm [shape: bf16[128,128], index: 4, kind: input, shape index: {}]   ;;  %s1011_s5 = inlined_call_operand.vmem [shape: f32[3,128], index: 5, kind: input, shape index: {}]   ;;  %s1012_s6 = inlined_call_operand.vmem [shape: bf16[16,128], index: 6, kind: output, shape index: {}]  }
   0x1   :  { %12 = vsyncpa [#allocation5], 0  ;;  %s901_s21 = smov [#allocation4]  }
   0x2   :  { %s32_s22 = sshll.u32 %s901_s21, 4  ;;  %s33_s22 = int_to_ptr.vmem [resolvable:$true] %s32_s22 }
   0x3   :  { %s845_s23 = scalar_lea.vmem %s33_s22, 2048  ;;  %p850_p1 = scmp.lt.s32.totalorder %s33_s22, %s33_s22 }
   0x4   :  { %p846_p0 = scmp.ne.s32.totalorder %s33_s22, %s845_s23  ;;  %p851_p2 = scmp.lt.s32.totalorder %s845_s23, %s845_s23 }
   0x6   :  { %p852_p3 = por %p851_p2, %p850_p1 }
   0x8   :  { %p853_p4 = pnand %p852_p3, %p846_p0 }
   0xa   :  { %856 = shalt.err (!%p853_p4)
}
   0xb   :  { %s902_s24 = smov 64   ;;  %s903_s25 = smov 4  }
   0xc   :  { %38 = dma.hbm_to_vmem [thread:$0]  %s1008_s2, 2048, %s33_s22, [#allocation5], %s902_s24, %s902_s24, %s903_s25  }
   0xd   :  { %s904_s28 = smov [#allocation2]  }
   0xe   :  { %s20_s29 = sshll.u32 %s904_s28, 4  ;;  %s21_s29 = int_to_ptr.vmem [resolvable:$true] %s20_s29 }
   0xf   :  { %s865_s30 = scalar_lea.vmem %s21_s29, 2048  ;;  %p870_p6 = scmp.lt.s32.totalorder %s21_s29, %s21_s29 }
  0x10   :  { %p866_p5 = scmp.ne.s32.totalorder %s21_s29, %s865_s30  ;;  %p871_p7 = scmp.lt.s32.totalorder %s865_s30, %s865_s30 }
  0x12   :  { %p872_p8 = por %p871_p7, %p870_p6 }
  0x14   :  { %p873_p9 = pnand %p872_p8, %p866_p5 }
  0x16   :  { %876 = shalt.err (!%p873_p9)
}
  0x17   :  { %s905_s7 = smov 128   ;;  %s906_s8 = smov 8  }
  0x18   :  { %26 = dma.hbm_to_vmem [thread:$0]  %s1007_s1, 2048, %s21_s29, [#allocation3], %s905_s7, %s905_s7, %s906_s8  }
  0x19   :  { %s907_s11 = smov [#allocation6]  }
  0x1a   :  { %s46_s12 = sshll.u32 %s907_s11, 4  ;;  %s47_s12 = int_to_ptr.vmem [resolvable:$true] %s46_s12 }
  0x1b   :  { %s885_s2 = scalar_lea.vmem %s47_s12, 1024  ;;  %p890_p11 = scmp.lt.s32.totalorder %s47_s12, %s47_s12 }
  0x1c   :  { %p886_p10 = scmp.ne.s32.totalorder %s47_s12, %s885_s2  ;;  %p891_p12 = scmp.lt.s32.totalorder %s885_s2, %s885_s2 }
  0x1e   :  { %p892_p13 = por %p891_p12, %p890_p11 }
  0x20   :  { %p893_p0 = pnand %p892_p13, %p886_p10 }
  0x22   :  { %896 = shalt.err (!%p893_p0)
}
  0x23   :  { %52 = dma.hbm_to_vmem [thread:$0]  %s1010_s4, 1024, %s47_s12, [#allocation5], %s902_s24, %s902_s24, %s903_s25  }
  0x24   :  { %897 = dma.done.wait [#allocation3], 2048  }
  0x25   :  { %898 = vsyncadd [#allocation3], 4294965248 }
  0x26   :  { %899 = dma.done.wait [#allocation5], 3072  }
  0x27   :  { %900 = vsyncadd [#allocation5], 4294964224  ;;  %v908_v0 = vmov 0   ;;  %v780_v1 = vld [vmem:[#allocation2 + $0x74] ss:$8 sps:$4 sm:$0xff]   ;;  %v809_v16 = vld [vmem:[#allocation4 + $0x68] sm:$0xff]   ;;  %v251_v58 = vlaneseq }
  0x28   :  { %202 = vmatprep.mubr.bf16.mxu0 %v908_v0  ;;  %v782_v2 = vld [vmem:[#allocation2 + $0x70] ss:$8 sps:$4 sm:$0xff]   ;;  %170 = vmatprep.subr.bf16.mxu0 %v780_v1  ;;  %v783_v3 = vld [vmem:[#allocation2 + $0x64] ss:$8 sps:$4 sm:$0xff]   ;;  %v785_v4 = vld [vmem:[#allocation2 + $0x60] ss:$8 sps:$4 sm:$0xff]  }
  0x29   :  { %171 = vmatpush1.bf16.msra.mxu0 %v782_v2  ;;  %v786_v5 = vld [vmem:[#allocation2 + $0x54] ss:$8 sps:$4 sm:$0xff]   ;;  %v788_v6 = vld [vmem:[#allocation2 + $0x50] ss:$8 sps:$4 sm:$0xff]   ;;  %v789_v7 = vld [vmem:[#allocation2 + $0x44] ss:$8 sps:$4 sm:$0xff]  }
  0x2a   :  { %172 = vmatprep.subr.bf16.mxu0 %v783_v3  ;;  %v791_v8 = vld [vmem:[#allocation2 + $0x40] ss:$8 sps:$4 sm:$0xff]   ;;  %v792_v9 = vld [vmem:[#allocation2 + $0x34] ss:$8 sps:$4 sm:$0xff]   ;;  %v794_v11 = vld [vmem:[#allocation2 + $0x30] ss:$8 sps:$4 sm:$0xff]  }
  0x2b   :  { %v805_v10 = vld [vmem:[#allocation4 + $0x78] sm:$0xff]   ;;  %v795_v13 = vld [vmem:[#allocation2 + $0x24] ss:$8 sps:$4 sm:$0xff]   ;;  %v807_v14 = vld [vmem:[#allocation4 + $0x70] sm:$0xff]   ;;  %v909_v35 = vmov 0.0   ;;  %vm910_vm0 = vmmov 0  }
  0x2c   :  { %v806_v12 = vld [vmem:[#allocation4 + $0x38] sm:$0xff]   ;;  %690 = vmatprep.subr.bf16.mxu1 %v805_v10  ;;  %v808_v15 = vld [vmem:[#allocation4 + $0x30] sm:$0xff]   ;;  %v797_v17 = vld [vmem:[#allocation2 + $0x20] ss:$8 sps:$4 sm:$0xff]   ;;  %v252_v59 = vshrl.u32 %v251_v58, 7 }
  0x2d   :  { %173 = vmatpush1.bf16.msra.mxu0 %v785_v4  ;;  %691 = vmatpush3.bf16.msra.mxu1 %v806_v12  ;;  %v798_v18 = vld [vmem:[#allocation2 + $0x14] ss:$8 sps:$4 sm:$0xff]   ;;  %v810_v19 = vld [vmem:[#allocation4 + $0x28] sm:$0xff]   ;;  %v811_v20 = vld [vmem:[#allocation4 + $0x60] sm:$0xff]  }
  0x2e   :  { %174 = vmatprep.subr.bf16.mxu0 %v786_v5  ;;  %692 = vmatprep.subr.bf16.mxu1 %v807_v14  ;;  %v800_v21 = vld [vmem:[#allocation2 + $0x10] ss:$8 sps:$4 sm:$0xff]   ;;  %v812_v22 = vld [vmem:[#allocation4 + $0x20] sm:$0xff]   ;;  %v817_v30 = vld [vmem:[#allocation4 + $0x48] sm:$0xff]   ;;  %v253_v60 = vsub.s32 0, %v252_v59 }
  0x2f   :  { %v801_v23 = vld [vmem:[#allocation2 + $0x4] ss:$8 sps:$4 sm:$0xff]   ;;  %v813_v24 = vld [vmem:[#allocation4 + $0x58] sm:$0xff]   ;;  %v803_v25 = vld [vmem:[#allocation2] ss:$8 sps:$4 sm:$0xff]  }
  0x30   :  { %v814_v26 = vld [vmem:[#allocation4 + $0x18] sm:$0xff]   ;;  %v804_v27 = vld [vmem:[%s1006_s0] sm:$0xff]   ;;  %v815_v28 = vld [vmem:[#allocation4 + $0x50] sm:$0xff]  }
  0x31   :  { %175 = vmatpush1.bf16.msra.mxu0 %v788_v6  ;;  %693 = vmatpush3.bf16.msra.mxu1 %v808_v15  ;;  %v816_v29 = vld [vmem:[#allocation4 + $0x10] sm:$0xff]   ;;  %v818_v31 = vld [vmem:[#allocation4 + $0x8] sm:$0xff]   ;;  %v819_v32 = vld [vmem:[#allocation4 + $0x40] sm:$0xff]  }
  0x32   :  { %176 = vmatprep.subr.bf16.mxu0 %v789_v7  ;;  %694 = vmatprep.subr.bf16.mxu1 %v809_v16  ;;  %v820_v33 = vld [vmem:[#allocation4] sm:$0xff]   ;;  %v821_v34 = vld [vmem:[%s1009_s3 + $0x38] sm:$0xff]   ;;  %v822_v36 = vld [vmem:[%s1009_s3 + $0x30] sm:$0xff]  }
  0x33   :  { %v823_v37 = vld [vmem:[%s1009_s3 + $0x28] sm:$0xff]   ;;  %v824_v38 = vld [vmem:[%s1009_s3 + $0x20] sm:$0xff]   ;;  %v825_v49 = vld [vmem:[%s1009_s3 + $0x18] sm:$0xff]  }
  0x34   :  { %v826_v50 = vld [vmem:[%s1009_s3 + $0x10] sm:$0xff]   ;;  %v827_v51 = vld [vmem:[%s1009_s3 + $0x8] sm:$0xff]   ;;  %v828_v52 = vld [vmem:[%s1009_s3] sm:$0xff]  }
  0x35   :  { %177 = vmatpush1.bf16.msra.mxu0 %v791_v8  ;;  %695 = vmatpush3.bf16.msra.mxu1 %v810_v19  ;;  %v829_v53 = vld [vmem:[#allocation6 + $0x38] sm:$0xff]   ;;  %v830_v54 = vld [vmem:[#allocation6 + $0x30] sm:$0xff]   ;;  %v831_v55 = vld [vmem:[#allocation6 + $0x28] sm:$0xff]  }
  0x36   :  { %178 = vmatprep.subr.bf16.mxu0 %v792_v9  ;;  %696 = vmatprep.subr.bf16.mxu1 %v811_v20  ;;  %v832_v56 = vld [vmem:[#allocation6 + $0x20] sm:$0xff]   ;;  %v833_v57 = vld [vmem:[#allocation6 + $0x18] sm:$0xff]   ;;  %v834_v10 = vld [vmem:[#allocation6 + $0x10] sm:$0xff]  }
  0x37   :  { %v67_v62 = vld [vmem:[%s1011_s5] sm:$0x7] }
  0x38   :  { %v254_v0 = vrot.slane %v67_v62, %v253_v60  ;;  %v836_v12 = vld [vmem:[#allocation6] sm:$0xff]  }
  0x39   :  { %179 = vmatpush1.bf16.msra.mxu0 %v794_v11  ;;  %697 = vmatpush3.bf16.msra.mxu1 %v812_v22  ;;  %v835_v11 = vld [vmem:[#allocation6 + $0x8] sm:$0xff]  }
  0x3a   :  { %180 = vmatprep.subr.bf16.mxu0 %v795_v13  ;;  %698 = vmatprep.subr.bf16.mxu1 %v813_v24  ;;  %v413_v13 = vsub.s32 1, %v252_v59  ;;  %v525_v24 = vsub.s32 2, %v252_v59 }
  0x3c   :  { %v414_v14 = vrot.slane %v67_v62, %v413_v13 }
  0x3d   :  { %181 = vmatpush1.bf16.msra.mxu0 %v797_v17  ;;  %699 = vmatpush3.bf16.msra.mxu1 %v814_v26  ;;  %v526_v26 = vrot.slane %v67_v62, %v525_v24 }
  0x3e   :  { %182 = vmatprep.subr.bf16.mxu0 %v798_v18  ;;  %700 = vmatprep.subr.bf16.mxu1 %v815_v28 }
  0x41   :  { %183 = vmatpush1.bf16.msra.mxu0 %v800_v21  ;;  %701 = vmatpush3.bf16.msra.mxu1 %v816_v29 }
  0x42   :  { %184 = vmatprep.subr.bf16.mxu0 %v801_v23  ;;  %702 = vmatprep.subr.bf16.mxu1 %v817_v30 }
  0x45   :  { %185 = vmatpush1.bf16.msra.mxu0 %v803_v25  ;;  %703 = vmatpush3.bf16.msra.mxu1 %v818_v31 }
  0x46   :  { %704 = vmatprep.subr.bf16.mxu1 %v819_v32  ;;  %730 = vmatprep.subr.bf16.mxu0 %v909_v35 }
  0x48   :  { %203 = vmatmul.mubr.bf16.vlgmr.msra.gmra.mxu0 %v804_v27 }
  0x49   :  { %705 = vmatpush3.bf16.msra.mxu1 %v820_v33  ;;  %731 = vmatpush3.bf16.msra.mxu0 %v821_v34 }
  0x4a   :  { %750 = vmatprep.subr.bf16.mxu1 %v909_v35  ;;  %732 = vmatprep.subr.bf16.mxu0 %v909_v35 }
  0x4b   :  { %746 = vmatprep.mubr.msk.bf16.mxu0 %vm910_vm0, %v909_v35 }
  0x4d   :  { %733 = vmatpush3.bf16.msra.mxu0 %v822_v36 }
  0x4e   :  { %734 = vmatprep.subr.bf16.mxu0 %v909_v35 }
  0x51   :  { %735 = vmatpush3.bf16.msra.mxu0 %v823_v37 }
  0x52   :  { %736 = vmatprep.subr.bf16.mxu0 %v909_v35 }
  0x55   :  { %737 = vmatpush3.bf16.msra.mxu0 %v824_v38 }
  0x56   :  { %738 = vmatprep.subr.bf16.mxu0 %v909_v35 }
  0x59   :  { %739 = vmatpush3.bf16.msra.mxu0 %v825_v49 }
  0x5a   :  { %740 = vmatprep.subr.bf16.mxu0 %v909_v35 }
  0x5d   :  { %741 = vmatpush3.bf16.msra.mxu0 %v826_v50 }
  0x5e   :  { %742 = vmatprep.subr.bf16.mxu0 %v909_v35 }
  0x61   :  { %743 = vmatpush3.bf16.msra.mxu0 %v827_v51 }
  0x62   :  { %744 = vmatprep.subr.bf16.mxu0 %v909_v35 }
  0x65   :  { %745 = vmatpush3.bf16.msra.mxu0 %v828_v52 }
 0x108   :  { %v204_v39 = vpop.f32.mrf.mxu0 }
 0x109   :  { %v213_v46 = vmax.f32 %v204_v39, 0.0 }
 0x10a   :  { %v206_v40 = vpop.f32.mrf.mxu0 }
 0x10b   :  { %v214_v44 = vmax.f32 %v206_v40, 0.0 }
 0x10c   :  { %v208_v41 = vpop.f32.mrf.mxu0 }
 0x10d   :  { %v215_v42 = vmax.f32 %v208_v41, 0.0 }
 0x10e   :  { %v210_v43 = vpop.f32.mrf.mxu0 }
 0x10f   :  { %v216_v45 = vmax.f32 %v210_v43, 0.0  ;;  %v217_v48 = vpack.c.bf16 %v215_v42, %v213_v46 }
 0x111   :  { %v218_v47 = vpack.c.bf16 %v216_v45, %v214_v44 }
 0x113   :  { %383 = vmatprep.mubr.bf16.mxu1 %v218_v47 }
 0x114   :  { %384 = vmatmul.mubr.bf16.vlgmr.msra.gmra.mxu1 %v217_v48 }
 0x115   :  { %766 = vmatprep.mubr.msk.bf16.mxu1 %vm910_vm0, %v909_v35  ;;  %751 = vmatpush3.bf16.msra.mxu1 %v829_v53 }
 0x116   :  { %752 = vmatprep.subr.bf16.mxu1 %v909_v35 }
 0x119   :  { %753 = vmatpush3.bf16.msra.mxu1 %v830_v54 }
 0x11a   :  { %754 = vmatprep.subr.bf16.mxu1 %v909_v35 }
 0x11d   :  { %755 = vmatpush3.bf16.msra.mxu1 %v831_v55 }
 0x11e   :  { %756 = vmatprep.subr.bf16.mxu1 %v909_v35 }
 0x121   :  { %757 = vmatpush3.bf16.msra.mxu1 %v832_v56 }
 0x122   :  { %758 = vmatprep.subr.bf16.mxu1 %v909_v35 }
 0x125   :  { %759 = vmatpush3.bf16.msra.mxu1 %v833_v57 }
 0x126   :  { %760 = vmatprep.subr.bf16.mxu1 %v909_v35 }
 0x129   :  { %761 = vmatpush3.bf16.msra.mxu1 %v834_v10 }
 0x12a   :  { %762 = vmatprep.subr.bf16.mxu1 %v909_v35 }
 0x12d   :  { %763 = vmatpush3.bf16.msra.mxu1 %v835_v11 }
 0x12e   :  { %764 = vmatprep.subr.bf16.mxu1 %v909_v35 }
 0x131   :  { %765 = vmatpush3.bf16.msra.mxu1 %v836_v12 }
 0x1d4   :  { %v706_v61 = vpop.f32.mrf.mxu1 }
 0x1d6   :  { %v707_v63 = vpop.f32.mrf.mxu1 }
 0x1d7   :  { %v708_v1 = vadd.f32 %v707_v63, %v706_v61 }
 0x1d8   :  { %v709_v2 = vpop.f32.mrf.mxu1 }
 0x1d9   :  { %v386_v4 = vadd.f32 %v708_v1, %v254_v0 }
 0x1da   :  { %v710_v3 = vpop.f32.mrf.mxu1 }
 0x1db   :  { %v711_v5 = vadd.f32 %v710_v3, %v709_v2  ;;  %v392_v7 = vmax.f32 %v386_v4, 0.0 }
 0x1dd   :  { %v389_v6 = vadd.f32 %v711_v5, %v254_v0 }
 0x1df   :  { %v393_v8 = vmax.f32 %v389_v6, 0.0 }
 0x1e1   :  { %v394_v9 = vpack.c.bf16 %v393_v8, %v392_v7 }
 0x1e3   :  { %747 = vmatmul.mubr.bf16.vlgmr.msra.gmra.mxu0 %v394_v9 }
 0x2a3   :  { %v497_v15 = vpop.f32.mrf.mxu0 }
 0x2a4   :  { %v498_v17 = vadd.f32 %v497_v15, %v414_v14 }
 0x2a5   :  { %v748_v16 = vpop.f32.mrf.mxu0 }
 0x2a6   :  { %v504_v21 = vmax.f32 %v498_v17, 0.0 }
 0x2a7   :  { %v500_v18 = vpop.f32.mrf.mxu0 }
 0x2a8   :  { %v501_v19 = vadd.f32 %v500_v18, %v414_v14 }
 0x2a9   :  { %v749_v20 = vpop.f32.mrf.mxu0 }
 0x2aa   :  { %v505_v22 = vmax.f32 %v501_v19, 0.0 }
 0x2ac   :  { %v506_v23 = vpack.c.bf16 %v505_v22, %v504_v21 }
 0x2ae   :  { %767 = vmatmul.mubr.bf16.vlgmr.msra.gmra.mxu1 %v506_v23 }
 0x36e   :  { %v609_v25 = vpop.f32.mrf.mxu1 }
 0x36f   :  { %v610_v29 = vadd.f32 %v609_v25, %v526_v26 }
 0x370   :  { %v768_v27 = vpop.f32.mrf.mxu1 }
 0x372   :  { %v612_v28 = vpop.f32.mrf.mxu1 }
 0x373   :  { %v613_v30 = vadd.f32 %v612_v28, %v526_v26 }
 0x374   :  { %v769_v31 = vpop.f32.mrf.mxu1 }
 0x375   :  { %v688_v32 = vpack.c.bf16 %v613_v30, %v610_v29 }
 0x377   :  { %689 = vst [vmem:[%s1012_s6] sm:$0xff] %v688_v32  }
 0x378   :  { %630 = vsyncpa [#allocation3], 1 }
 0x379   :  { %631 = vsyncpa [#allocation5], 1 }

</bundles_post_ra>
